<compile_context>
chip_gen: v7x
topology: tpu7x:2x2x1
jax: 0.10.0
libtpu: 0.0.40
codegen_flags: <defaults>
</compile_context>

<pallas_src>
import functools

import jax
import jax.numpy as jnp
from jax.experimental import pallas as pl
from jax.experimental.pallas import tpu as pltpu


D = 128  # lane-dense padded width for every hidden layer's features


def _round_up(n, m):
    return ((n + m - 1) // m) * m


def _mlp_kernel(x_ref, w1_ref, w_ref, b_ref, o_ref, *, mxu_dtype):
    # x_ref : (tb, in_dim_p)        activations (original dtype)
    # w1_ref: (in_dim_p, D)         fc1 weight (mxu_dtype)
    # w_ref : (3, D, D)             fc2 / fc3 / out weights (mxu_dtype)
    # b_ref : (4, 1, D)             fc1..out biases (fp32)
    # o_ref : (tb, 1)               output column (fp32)
    x = x_ref[...].astype(mxu_dtype)

    # fc1 + ReLU (dropout1 = identity at inference)
    h = jnp.dot(x, w1_ref[...], preferred_element_type=jnp.float32) + b_ref[0]
    h = jnp.maximum(h, 0.0)

    # fc2 + ReLU (dropout2 = identity)
    h = jnp.dot(h.astype(mxu_dtype), w_ref[0],
                preferred_element_type=jnp.float32) + b_ref[1]
    h = jnp.maximum(h, 0.0)

    # fc3 + ReLU (dropout3 = identity)
    h = jnp.dot(h.astype(mxu_dtype), w_ref[1],
                preferred_element_type=jnp.float32) + b_ref[2]
    h = jnp.maximum(h, 0.0)

    # out (no activation).  Padded weight columns / biases are exactly zero, so
    # only column 0 of y is real -> store just that column (compact output).
    y = jnp.dot(h.astype(mxu_dtype), w_ref[2],
                preferred_element_type=jnp.float32) + b_ref[3]
    o_ref[...] = y[:, :1].astype(o_ref.dtype)


def _pack_params(params, mxu_dtype):
    """Pack the 4 Linear layers:
         w1      -> (in_dim_p, D)  separate operand (real feature width kept)
         w2,w3,w4-> (3, D, D)      zero-padded slab
         b1..b4  -> (4, 1, D)      zero-padded fp32 slab
    Zero padding is exact: zero weight rows/cols + zero biases propagate exactly
    through ReLU and downstream matmuls."""
    (w1, b1) = params[0]
    in_dim, hidden = w1.shape
    half = params[2][0].shape[1]
    assert hidden <= D and half <= D, (
        f"hidden dims must be <= {D} (got hidden_dim={hidden}, hidden_dim//2={half})")

    in_dim_p = max(8, _round_up(in_dim, 8))
    w1_p = jnp.zeros((in_dim_p, D), jnp.float32).at[:in_dim, :hidden].set(w1)

    w_slab, b_slab = [], []
    b_slab.append(jnp.zeros((1, D), jnp.float32).at[:, :hidden].set(b1.reshape(1, -1)))
    for (w, b) in params[1:]:
        fi, fo = w.shape
        w_slab.append(jnp.zeros((D, D), jnp.float32).at[:fi, :fo].set(w))
        b_slab.append(jnp.zeros((1, D), jnp.float32).at[:, :fo].set(b.reshape(1, -1)))

    # Weights are cast for the MXU; biases stay fp32 (VPU elementwise path).
    return (w1_p.astype(mxu_dtype),
            jnp.stack(w_slab).astype(mxu_dtype),
            jnp.stack(b_slab))


def risk_benefit_classifier(x, params, *, mxu_dtype=jnp.bfloat16, max_tile_b=512):
    """Fused forward pass.  x: [B, input_dim].  Returns [B, 1] float32."""
    B, in_dim = x.shape
    w1_p, w_slab, b_slab = _pack_params(params, mxu_dtype)
    in_dim_p = w1_p.shape[0]

    # Batch tile: multiple of 8 sublanes, capped at max_tile_b (512 default,
    # up to ~1024 is safe within even v7x's 32 MiB scoped VMEM default).
    tb = min(_round_up(max_tile_b, 8), max(8, _round_up(B, 8)))
    b_pad = _round_up(B, tb)
    n_tiles = b_pad // tb

    # Pad only what is needed (batch rows to the tile; features to a multiple of
    # 8).  No (b_pad, 128) slab is materialized anymore.
    pad_r, pad_c = b_pad - B, in_dim_p - in_dim
    x_p = jnp.pad(x, ((0, pad_r), (0, pad_c))) if (pad_r or pad_c) else x

    out = pl.pallas_call(
        functools.partial(_mlp_kernel, mxu_dtype=mxu_dtype),
        out_shape=jax.ShapeDtypeStruct((b_pad, 1), jnp.float32),
        grid=(n_tiles,),
        in_specs=[
            pl.BlockSpec((tb, in_dim_p), lambda i: (i, 0)),     # x: tiled over batch
            pl.BlockSpec((in_dim_p, D), lambda i: (0, 0)),      # fc1 weight (resident)
            pl.BlockSpec((3, D, D), lambda i: (0, 0, 0)),       # fc2/fc3/out weights
            pl.BlockSpec((4, 1, D), lambda i: (0, 0, 0)),       # biases (resident)
        ],
        out_specs=pl.BlockSpec((tb, 1), lambda i: (i, 0)),      # compact output column
        compiler_params=pltpu.CompilerParams(
            dimension_semantics=("parallel",)),
    )(x_p, w1_p, w_slab, b_slab)

    return out[:B]


def init_params(key, input_dim, hidden_dim):
    """Deterministic init matching nn.Linear's default U(-1/sqrt(fan_in), +).
    Weights stored [in, out] (transposed vs. PyTorch's [out, in])."""
    dims = [(input_dim, hidden_dim),
            (hidden_dim, hidden_dim),
            (hidden_dim, hidden_dim // 2),
            (hidden_dim // 2, 1)]
    params = []
    for (fan_in, fan_out) in dims:
        key, kw, kb = jax.random.split(key, 3)
        bound = 1.0 / jnp.sqrt(float(fan_in))
        w = jax.random.uniform(kw, (fan_in, fan_out), jnp.float32, -bound, bound)
        b = jax.random.uniform(kb, (1, fan_out), jnp.float32, -bound, bound)
        params.append((w, b))
    return params


def _ref_forward(x, params):
    (w1, b1), (w2, b2), (w3, b3), (w4, b4) = params
    h = jnp.maximum(x @ w1 + b1, 0.0)
    h = jnp.maximum(h @ w2 + b2, 0.0)
    h = jnp.maximum(h @ w3 + b3, 0.0)
    return h @ w4 + b4


if __name__ == "__main__":
    key = jax.random.PRNGKey(0)
    batch, input_dim, hidden_dim = 8, 32, 32

    k_x, k_p, k_x2 = jax.random.split(key, 3)
    x = jax.random.normal(k_x, (batch, input_dim), jnp.float32)
    params = init_params(k_p, input_dim, hidden_dim)
    ref = _ref_forward(x, params)

    # 1) Exact fp32 MXU-operand path: tight tolerance.
    out_f32 = risk_benefit_classifier(x, params, mxu_dtype=jnp.float32)
    jax.block_until_ready(out_f32)
    assert out_f32.shape == (batch, 1)
    assert jnp.allclose(out_f32, ref, atol=1e-4, rtol=1e-4)

    # 2) Default bf16 MXU-operand inference path: operand-rounding tolerance.
    out_bf16 = risk_benefit_classifier(x, params)
    jax.block_until_ready(out_bf16)
    assert out_bf16.shape == (batch, 1)
    assert jnp.allclose(out_bf16, ref, atol=7.5e-2, rtol=5e-2)

    # 3) Multi-tile grid + batch padding path (3 tiles of 16 rows, 48-row pad).
    x2 = jax.random.normal(k_x2, (40, input_dim), jnp.float32)
    out_multi = risk_benefit_classifier(x2, params, mxu_dtype=jnp.float32,
                                        max_tile_b=16)
    jax.block_until_ready(out_multi)
    assert out_multi.shape == (40, 1)
    assert jnp.allclose(out_multi, _ref_forward(x2, params), atol=1e-4, rtol=1e-4)

    print("KERNEL_OK")
</pallas_src>

<mosaic_0001>
module attributes {stable_mosaic.version = 11 : i64} {
  func.func @_mlp_kernel(%arg0: i32, %arg1: memref<8x32xf32, #tpu.memory_space<vmem>>, %arg2: memref<32x128xf32, #tpu.memory_space<vmem>>, %arg3: memref<3x128x128xf32, #tpu.memory_space<vmem>>, %arg4: memref<4x1x128xf32, #tpu.memory_space<vmem>>, %arg5: memref<8x1xf32, #tpu.memory_space<vmem>>) attributes {dimension_semantics = [#tpu.dimension_semantics<parallel>], iteration_bounds = array<i64: 1>, scalar_prefetch = 0 : i64, scratch_operands = 0 : i64, tpu.core_type = #tpu.core_type<tc>, window_params = [{transform_indices = @transform_0, window_bounds = array<i64: 8, 32>}, {pipeline_mode = #tpu.pipeline_mode<synchronous>, transform_indices = @transform_1, window_bounds = array<i64: 32, 128>}, {pipeline_mode = #tpu.pipeline_mode<synchronous>, transform_indices = @transform_2, window_bounds = array<i64: 3, 128, 128>}, {pipeline_mode = #tpu.pipeline_mode<synchronous>, transform_indices = @transform_3, window_bounds = array<i64: 4, 1, 128>}, {transform_indices = @transform_4, window_bounds = array<i64: 8, 1>}]} {
    %c0 = arith.constant 0 : index
    %c0_0 = arith.constant 0 : index
    %0 = vector.load %arg1[%c0, %c0_0] : memref<8x32xf32, #tpu.memory_space<vmem>>, vector<8x32xf32>
    %c0_1 = arith.constant 0 : index
    %c0_2 = arith.constant 0 : index
    %1 = vector.load %arg2[%c0_1, %c0_2] : memref<32x128xf32, #tpu.memory_space<vmem>>, vector<32x128xf32>
    %cst = arith.constant dense<0.000000e+00> : vector<8x128xf32>
    %2 = tpu.matmul %0, %1, %cst {dimension_numbers = #tpu.dot_dimension_numbers<[1], [0], [0], [1], [0, 0, 1, 1], [], []>} : vector<8x32xf32>, vector<32x128xf32>, vector<8x128xf32> -> vector<8x128xf32>
    %c0_3 = arith.constant 0 : index
    %c0_4 = arith.constant 0 : index
    %c0_5 = arith.constant 0 : index
    %3 = vector.load %arg4[%c0_3, %c0_4, %c0_5] : memref<4x1x128xf32, #tpu.memory_space<vmem>>, vector<1x1x128xf32>
    %4 = vector.shape_cast %3 : vector<1x1x128xf32> to vector<1x128xf32>
    %5 = vector.broadcast %4 : vector<1x128xf32> to vector<8x128xf32>
    %6 = arith.addf %2, %5 : vector<8x128xf32>
    %cst_6 = arith.constant 0.000000e+00 : f32
    %7 = vector.broadcast %cst_6 : f32 to vector<8x128xf32>
    %8 = arith.maximumf %6, %7 : vector<8x128xf32>
    %c0_7 = arith.constant 0 : index
    %c0_8 = arith.constant 0 : index
    %c0_9 = arith.constant 0 : index
    %9 = vector.load %arg3[%c0_7, %c0_8, %c0_9] : memref<3x128x128xf32, #tpu.memory_space<vmem>>, vector<1x128x128xf32>
    %10 = vector.shape_cast %9 : vector<1x128x128xf32> to vector<128x128xf32>
    %cst_10 = arith.constant dense<0.000000e+00> : vector<8x128xf32>
    %11 = tpu.matmul %8, %10, %cst_10 {dimension_numbers = #tpu.dot_dimension_numbers<[1], [0], [0], [1], [0, 0, 1, 1], [], []>} : vector<8x128xf32>, vector<128x128xf32>, vector<8x128xf32> -> vector<8x128xf32>
    %c1 = arith.constant 1 : index
    %c0_11 = arith.constant 0 : index
    %c0_12 = arith.constant 0 : index
    %12 = vector.load %arg4[%c1, %c0_11, %c0_12] : memref<4x1x128xf32, #tpu.memory_space<vmem>>, vector<1x1x128xf32>
    %13 = vector.shape_cast %12 : vector<1x1x128xf32> to vector<1x128xf32>
    %14 = vector.broadcast %13 : vector<1x128xf32> to vector<8x128xf32>
    %15 = arith.addf %11, %14 : vector<8x128xf32>
    %cst_13 = arith.constant 0.000000e+00 : f32
    %16 = vector.broadcast %cst_13 : f32 to vector<8x128xf32>
    %17 = arith.maximumf %15, %16 : vector<8x128xf32>
    %c1_14 = arith.constant 1 : index
    %c0_15 = arith.constant 0 : index
    %c0_16 = arith.constant 0 : index
    %18 = vector.load %arg3[%c1_14, %c0_15, %c0_16] : memref<3x128x128xf32, #tpu.memory_space<vmem>>, vector<1x128x128xf32>
    %19 = vector.shape_cast %18 : vector<1x128x128xf32> to vector<128x128xf32>
    %cst_17 = arith.constant dense<0.000000e+00> : vector<8x128xf32>
    %20 = tpu.matmul %17, %19, %cst_17 {dimension_numbers = #tpu.dot_dimension_numbers<[1], [0], [0], [1], [0, 0, 1, 1], [], []>} : vector<8x128xf32>, vector<128x128xf32>, vector<8x128xf32> -> vector<8x128xf32>
    %c2 = arith.constant 2 : index
    %c0_18 = arith.constant 0 : index
    %c0_19 = arith.constant 0 : index
    %21 = vector.load %arg4[%c2, %c0_18, %c0_19] : memref<4x1x128xf32, #tpu.memory_space<vmem>>, vector<1x1x128xf32>
    %22 = vector.shape_cast %21 : vector<1x1x128xf32> to vector<1x128xf32>
    %23 = vector.broadcast %22 : vector<1x128xf32> to vector<8x128xf32>
    %24 = arith.addf %20, %23 : vector<8x128xf32>
    %cst_20 = arith.constant 0.000000e+00 : f32
    %25 = vector.broadcast %cst_20 : f32 to vector<8x128xf32>
    %26 = arith.maximumf %24, %25 : vector<8x128xf32>
    %c2_21 = arith.constant 2 : index
    %c0_22 = arith.constant 0 : index
    %c0_23 = arith.constant 0 : index
    %27 = vector.load %arg3[%c2_21, %c0_22, %c0_23] : memref<3x128x128xf32, #tpu.memory_space<vmem>>, vector<1x128x128xf32>
    %28 = vector.shape_cast %27 : vector<1x128x128xf32> to vector<128x128xf32>
    %cst_24 = arith.constant dense<0.000000e+00> : vector<8x128xf32>
    %29 = tpu.matmul %26, %28, %cst_24 {dimension_numbers = #tpu.dot_dimension_numbers<[1], [0], [0], [1], [0, 0, 1, 1], [], []>} : vector<8x128xf32>, vector<128x128xf32>, vector<8x128xf32> -> vector<8x128xf32>
    %c3 = arith.constant 3 : index
    %c0_25 = arith.constant 0 : index
    %c0_26 = arith.constant 0 : index
    %30 = vector.load %arg4[%c3, %c0_25, %c0_26] : memref<4x1x128xf32, #tpu.memory_space<vmem>>, vector<1x1x128xf32>
    %31 = vector.shape_cast %30 : vector<1x1x128xf32> to vector<1x128xf32>
    %32 = vector.broadcast %31 : vector<1x128xf32> to vector<8x128xf32>
    %33 = arith.addf %29, %32 : vector<8x128xf32>
    %34 = vector.extract_strided_slice %33 {offsets = [0, 0], sizes = [8, 1], strides = [1, 1]} : vector<8x128xf32> to vector<8x1xf32>
    %c0_27 = arith.constant 0 : index
    %c0_28 = arith.constant 0 : index
    %35 = vector.load %arg5[%c0_27, %c0_28] : memref<8x1xf32, #tpu.memory_space<vmem>>, vector<8x1xf32>
    tpu.vector_store %arg5[%c0_27, %c0_28], %34 {strides = array<i32>} : memref<8x1xf32, #tpu.memory_space<vmem>>, vector<8x1xf32>,
    return
  }
  func.func @transform_0(%arg0: i32) -> (i32, i32) {
    %c0_i32 = arith.constant 0 : i32
    %c0_i32_0 = arith.constant 0 : i32
    return %arg0, %c0_i32 : i32, i32
  }
  func.func @transform_1(%arg0: i32) -> (i32, i32) {
    %c0_i32 = arith.constant 0 : i32
    %c0_i32_0 = arith.constant 0 : i32
    %c0_i32_1 = arith.constant 0 : i32
    return %c0_i32, %c0_i32_0 : i32, i32
  }
  func.func @transform_2(%arg0: i32) -> (i32, i32, i32) {
    %c0_i32 = arith.constant 0 : i32
    %c0_i32_0 = arith.constant 0 : i32
    %c0_i32_1 = arith.constant 0 : i32
    %c0_i32_2 = arith.constant 0 : i32
    return %c0_i32, %c0_i32_0, %c0_i32_1 : i32, i32, i32
  }
  func.func @transform_3(%arg0: i32) -> (i32, i32, i32) {
    %c0_i32 = arith.constant 0 : i32
    %c0_i32_0 = arith.constant 0 : i32
    %c0_i32_1 = arith.constant 0 : i32
    %c0_i32_2 = arith.constant 0 : i32
    return %c0_i32, %c0_i32_0, %c0_i32_1 : i32, i32, i32
  }
  func.func @transform_4(%arg0: i32) -> (i32, i32) {
    %c0_i32 = arith.constant 0 : i32
    %c0_i32_0 = arith.constant 0 : i32
    return %arg0, %c0_i32 : i32, i32
  }
}

</mosaic_0001>

<bundles_post_ra>
// kernel: tpu_custom_call.1
= control target key start
LH: loop header
LB: loop body
LE: loop exit
PB: predicated region body
PF: predicated region fallthrough
CT: control target
= control target key end

     0   :  { %9 = vsyncpa [#allocation3], 0  ;;  %s897_s0 = inlined_call_operand.hbm [shape: f32[8,32], index: 0, kind: input, shape index: {}]   ;;  %s898_s1 = inlined_call_operand.hbm [shape: f32[32,128], index: 1, kind: input, shape index: {}]   ;;  %s899_s2 = inlined_call_operand.hbm [shape: f32[3,128,128], index: 2, kind: input, shape index: {}]   ;;  %s900_s3 = inlined_call_operand.vmem [shape: f32[4,1,128], index: 3, kind: input, shape index: {}]   ;;  %s901_s4 = inlined_call_operand.vmem [shape: f32[8,1], index: 4, kind: output, shape index: {}]  }
   0x1   :  { %10 = vsyncpa [#allocation5], 0  ;;  %s773_s15 = smov [#allocation4]   ;;  %s703_s19 = scalar_lea.hbm %s898_s1, 512 }
   0x2   :  { %s26_s16 = sshll.u32 %s773_s15, 4  ;;  %p704_p0 = scmp.ne.s32.totalorder %s898_s1, %s703_s19  ;;  %s27_s16 = int_to_ptr.vmem [resolvable:$true] %s26_s16 }
   0x3   :  { %p707_p1 = scmp.lt.u32.totalorder %s703_s19, %s898_s1 }
   0x5   :  { %p709_p2 = pnand %p707_p1, %p704_p0 }
   0x7   :  { %712 = shalt.err (!%p709_p2)
}
   0x8   :  { %s713_s24 = scalar_lea.vmem %s27_s16, 512  ;;  %p718_p4 = scmp.lt.s32.totalorder %s27_s16, %s27_s16 }
   0x9   :  { %p714_p3 = scmp.ne.s32.totalorder %s27_s16, %s713_s24  ;;  %p719_p5 = scmp.lt.s32.totalorder %s713_s24, %s713_s24 }
   0xb   :  { %p720_p6 = por %p719_p5, %p718_p4 }
   0xd   :  { %p721_p7 = pnand %p720_p6, %p714_p3 }
   0xf   :  { %724 = shalt.err (!%p721_p7)
}
  0x10   :  { %s774_s25 = smov 128   ;;  %s775_s26 = smov 8  }
  0x11   :  { %32 = dma.hbm_to_vmem [thread:$0]  %s898_s1, 512, %s27_s16, [#allocation5], %s774_s25, %s774_s25, %s775_s26  }
  0x12   :  { %s776_s29 = smov [#allocation2]   ;;  %s777_s5 = smov [#allocation6]  }
  0x13   :  { %s17_s30 = sshll.u32 %s776_s29, 4  ;;  %s38_s6 = sshll.u32 %s777_s5, 4  ;;  %s18_s30 = int_to_ptr.vmem [resolvable:$true] %s17_s30  ;;  %s39_s6 = int_to_ptr.vmem [resolvable:$true] %s38_s6 }
  0x14   :  { %s725_s9 = scalar_lea.hbm %s897_s0, 128 }
  0x15   :  { %p726_p8 = scmp.ne.s32.totalorder %s897_s0, %s725_s9  ;;  %p729_p9 = scmp.lt.u32.totalorder %s725_s9, %s897_s0 }
  0x17   :  { %p731_p10 = pnand %p729_p9, %p726_p8 }
  0x19   :  { %734 = shalt.err (!%p731_p10)
}
  0x1a   :  { %s735_s1 = scalar_lea.vmem %s18_s30, 128  ;;  %p740_p12 = scmp.lt.s32.totalorder %s18_s30, %s18_s30 }
  0x1b   :  { %p736_p11 = scmp.ne.s32.totalorder %s18_s30, %s735_s1  ;;  %p741_p13 = scmp.lt.s32.totalorder %s735_s1, %s735_s1 }
  0x1d   :  { %p742_p0 = por %p741_p13, %p740_p12 }
  0x1f   :  { %p743_p1 = pnand %p742_p0, %p736_p11 }
  0x21   :  { %746 = shalt.err (!%p743_p1)
}
  0x22   :  { %20 = dma.hbm_to_vmem [thread:$0]  %s897_s0, 128, %s18_s30, [#allocation3]  }
  0x23   :  { %s747_s18 = scalar_lea.hbm %s899_s2, 6144 }
  0x24   :  { %p748_p2 = scmp.ne.s32.totalorder %s899_s2, %s747_s18  ;;  %p751_p3 = scmp.lt.u32.totalorder %s747_s18, %s899_s2 }
  0x26   :  { %p753_p4 = pnand %p751_p3, %p748_p2 }
  0x28   :  { %756 = shalt.err (!%p753_p4)
}
  0x29   :  { %s757_s23 = scalar_lea.vmem %s39_s6, 6144  ;;  %p762_p6 = scmp.lt.s32.totalorder %s39_s6, %s39_s6 }
  0x2a   :  { %p758_p5 = scmp.ne.s32.totalorder %s39_s6, %s757_s23  ;;  %p763_p7 = scmp.lt.s32.totalorder %s757_s23, %s757_s23 }
  0x2c   :  { %p764_p8 = por %p763_p7, %p762_p6 }
  0x2e   :  { %p765_p9 = pnand %p764_p8, %p758_p5 }
  0x30   :  { %768 = shalt.err (!%p765_p9)
}
  0x31   :  { %44 = dma.hbm_to_vmem [thread:$0]  %s899_s2, 6144, %s39_s6, [#allocation5], %s774_s25, %s774_s25, %s775_s26  }
  0x32   :  { %769 = dma.done.wait [#allocation3], 128  }
  0x33   :  { %770 = vsyncadd [#allocation3], 4294967168 }
  0x34   :  { %771 = dma.done.wait [#allocation5], 6656  }
  0x35   :  { %772 = vsyncadd [#allocation5], 4294960640  ;;  %v778_v0 = vmov 0.0|0.0   ;;  %vm779_vm0 = vmmov 0   ;;  %v780_v1 = vmov 0.0   ;;  %v57_v2 = vld [vmem:[#allocation4] sm:$0xff] }
  0x36   :  { %617 = vmatprep.subr.bf16.mxu0 %v778_v0  ;;  %509 = vmatprep.mubr.msk.f32.mxu0 %vm779_vm0, %v780_v1  ;;  %v58_v3 = vld [vmem:[#allocation4 + $0x8] sm:$0xff]  ;;  %v59_v4 = vld [vmem:[#allocation4 + $0x10] sm:$0xff]  ;;  %v60_v6 = vld [vmem:[#allocation4 + $0x18] sm:$0xff]  ;;  %vm68_vm1 = vcmask 261120   ;;  %vm429_vm2 = vcmask 7168  }
  0x37   :  { %623 = vmatprep.subr.bf16.mxu1 %v778_v0  ;;  %544 = vmatprep.mubr.msk.f32.mxu1 %vm779_vm0, %v780_v1  ;;  %v618_v5 = vpack.c.bf16 %v58_v3, %v57_v2  ;;  %v143_v7 = vld [vmem:[#allocation6] sm:$0xff]  ;;  %v144_v8 = vld [vmem:[#allocation6 + $0x8] sm:$0xff]  ;;  %v145_v9 = vld [vmem:[#allocation6 + $0x10] sm:$0xff]  ;;  %v621_v11 = vpack.c.bf16 %v60_v6, %v59_v4 }
  0x38   :  { %v146_v10 = vld [vmem:[#allocation6 + $0x18] sm:$0xff]  ;;  %v624_v12 = vpack.c.bf16 %v144_v8, %v143_v7  ;;  %v147_v14 = vld [vmem:[#allocation6 + $0x20] sm:$0xff]  ;;  %v148_v15 = vld [vmem:[#allocation6 + $0x28] sm:$0xff] }
  0x39   :  { %619 = vmatpush3.bf16.msra.mxu0 %v618_v5  ;;  %v627_v13 = vpack.c.bf16 %v146_v10, %v145_v9  ;;  %v56_v16 = vld [vmem:[#allocation2] sm:$0xff]  ;;  %v630_v17 = vpack.c.bf16 %v148_v15, %v147_v14  ;;  %v149_v18 = vld [vmem:[#allocation6 + $0x30] sm:$0xff]  ;;  %v151_v21 = vld [vmem:[#allocation6 + $0x40] sm:$0xff] }
  0x3a   :  { %620 = vmatprep.subr.bf16.mxu0 %v778_v0  ;;  %625 = vmatpush3.bf16.msra.mxu1 %v624_v12  ;;  %v150_v19 = vld [vmem:[#allocation6 + $0x38] sm:$0xff]  ;;  %v152_v22 = vld [vmem:[#allocation6 + $0x48] sm:$0xff]  ;;  %v153_v24 = vld [vmem:[#allocation6 + $0x50] sm:$0xff] }
  0x3b   :  { %626 = vmatprep.subr.bf16.mxu1 %v778_v0  ;;  %v633_v20 = vpack.c.bf16 %v150_v19, %v149_v18  ;;  %v636_v23 = vpack.c.bf16 %v152_v22, %v151_v21  ;;  %v154_v25 = vld [vmem:[#allocation6 + $0x58] sm:$0xff]  ;;  %v155_v27 = vld [vmem:[#allocation6 + $0x60] sm:$0xff]  ;;  %v156_v28 = vld [vmem:[#allocation6 + $0x68] sm:$0xff] }
  0x3c   :  { %v639_v26 = vpack.c.bf16 %v154_v25, %v153_v24  ;;  %v642_v29 = vpack.c.bf16 %v156_v28, %v155_v27  ;;  %v157_v30 = vld [vmem:[#allocation6 + $0x70] sm:$0xff]  ;;  %v158_v31 = vld [vmem:[#allocation6 + $0x78] sm:$0xff]  ;;  %v239_v33 = vld [vmem:[#allocation6 + $0x80] sm:$0xff] }
  0x3d   :  { %622 = vmatpush3.bf16.msra.mxu0 %v621_v11  ;;  %v645_v32 = vpack.c.bf16 %v158_v31, %v157_v30  ;;  %v240_v34 = vld [vmem:[#allocation6 + $0x88] sm:$0xff]  ;;  %v241_v35 = vld [vmem:[#allocation6 + $0x90] sm:$0xff]  ;;  %v242_v37 = vld [vmem:[#allocation6 + $0x98] sm:$0xff] }
  0x3e   :  { %647 = vmatprep.subr.bf16.mxu0 %v778_v0  ;;  %628 = vmatpush3.bf16.msra.mxu1 %v627_v13  ;;  %v648_v36 = vpack.c.bf16 %v240_v34, %v239_v33  ;;  %v651_v38 = vpack.c.bf16 %v242_v37, %v241_v35  ;;  %v243_v39 = vld [vmem:[#allocation6 + $0xa0] sm:$0xff]  ;;  %v244_v40 = vld [vmem:[#allocation6 + $0xa8] sm:$0xff]  ;;  %v245_v42 = vld [vmem:[#allocation6 + $0xb0] sm:$0xff] }
  0x3f   :  { %629 = vmatprep.subr.bf16.mxu1 %v778_v0  ;;  %v654_v41 = vpack.c.bf16 %v244_v40, %v243_v39  ;;  %v246_v43 = vld [vmem:[#allocation6 + $0xb8] sm:$0xff]  ;;  %v247_v45 = vld [vmem:[#allocation6 + $0xc0] sm:$0xff]  ;;  %v248_v46 = vld [vmem:[#allocation6 + $0xc8] sm:$0xff] }
  0x40   :  { %510 = vmatmul.mubr.msk.f32.vlgmr.msra.gmra.mrb[0].mxu0 %vm68_vm1, %v56_v16  ;;  %v657_v44 = vpack.c.bf16 %v246_v43, %v245_v42  ;;  %v660_v47 = vpack.c.bf16 %v248_v46, %v247_v45  ;;  %v249_v48 = vld [vmem:[#allocation6 + $0xd0] sm:$0xff]  ;;  %v250_v49 = vld [vmem:[#allocation6 + $0xd8] sm:$0xff]  ;;  %v251_v51 = vld [vmem:[#allocation6 + $0xe0] sm:$0xff] }
  0x41   :  { %579 = vmatprep.mubr.msk.f32.mxu0 %vm779_vm0, %v780_v1  ;;  %649 = vmatpush3.bf16.msra.mxu0 %v648_v36  ;;  %v663_v50 = vpack.c.bf16 %v250_v49, %v249_v48  ;;  %v252_v52 = vld [vmem:[#allocation6 + $0xe8] sm:$0xff]  ;;  %v437_v54 = vld [vmem:[%s900_s3] ss:$0 sm:$0xff]  ;;  %v254_v60 = vld [vmem:[#allocation6 + $0xf8] sm:$0xff] }
  0x42   :  { %631 = vmatpush3.bf16.msra.mxu1 %v630_v17  ;;  %650 = vmatprep.subr.bf16.mxu0 %v778_v0  ;;  %v666_v53 = vpack.c.bf16 %v252_v52, %v251_v51  ;;  %v253_v59 = vld [vmem:[#allocation6 + $0xf0] sm:$0xff]  ;;  %v335_v62 = vld [vmem:[#allocation6 + $0x100] sm:$0xff]  ;;  %v336_v63 = vld [vmem:[#allocation6 + $0x108] sm:$0xff] }
  0x43   :  { %632 = vmatprep.subr.bf16.mxu1 %v778_v0  ;;  %v669_v61 = vpack.c.bf16 %v254_v60, %v253_v59  ;;  %v337_v2 = vld [vmem:[#allocation6 + $0x110] sm:$0xff]  ;;  %v672_v3 = vpack.c.bf16 %v336_v63, %v335_v62  ;;  %v338_v4 = vld [vmem:[#allocation6 + $0x118] sm:$0xff]  ;;  %v339_v6 = vld [vmem:[#allocation6 + $0x120] sm:$0xff] }
  0x44   :  { %v675_v5 = vpack.c.bf16 %v338_v4, %v337_v2  ;;  %v340_v7 = vld [vmem:[#allocation6 + $0x128] sm:$0xff]  ;;  %v342_v9 = vld [vmem:[#allocation6 + $0x138] sm:$0xff]  ;;  %v343_v11 = vld [vmem:[#allocation6 + $0x140] sm:$0xff] }
  0x45   :  { %652 = vmatpush3.bf16.msra.mxu0 %v651_v38  ;;  %v678_v8 = vpack.c.bf16 %v340_v7, %v339_v6  ;;  %v344_v12 = vld [vmem:[#allocation6 + $0x148] sm:$0xff]  ;;  %v345_v14 = vld [vmem:[#allocation6 + $0x150] sm:$0xff]  ;;  %v346_v15 = vld [vmem:[#allocation6 + $0x158] sm:$0xff] }
  0x46   :  { %634 = vmatpush3.bf16.msra.mxu1 %v633_v20  ;;  %653 = vmatprep.subr.bf16.mxu0 %v778_v0  ;;  %v684_v13 = vpack.c.bf16 %v344_v12, %v343_v11  ;;  %v687_v16 = vpack.c.bf16 %v346_v15, %v345_v14  ;;  %v347_v17 = vld [vmem:[#allocation6 + $0x160] sm:$0xff]  ;;  %v348_v18 = vld [vmem:[#allocation6 + $0x168] sm:$0xff]  ;;  %v440_v20 = vld [vmem:[%s900_s3 + $0x1] ss:$0 sm:$0xff] }
  0x47   :  { %635 = vmatprep.subr.bf16.mxu1 %v778_v0  ;;  %v690_v19 = vpack.c.bf16 %v348_v18, %v347_v17  ;;  %v349_v25 = vld [vmem:[#allocation6 + $0x170] sm:$0xff] }
  0x48   :  { %v442_v28 = vld [vmem:[%s900_s3 + $0x2] ss:$0 sm:$0xff] }
  0x49   :  { %655 = vmatpush3.bf16.msra.mxu0 %v654_v41 }
  0x4a   :  { %637 = vmatpush3.bf16.msra.mxu1 %v636_v23  ;;  %656 = vmatprep.subr.bf16.mxu0 %v778_v0 }
  0x4b   :  { %638 = vmatprep.subr.bf16.mxu1 %v778_v0 }
  0x4d   :  { %658 = vmatpush3.bf16.msra.mxu0 %v657_v44 }
  0x4e   :  { %640 = vmatpush3.bf16.msra.mxu1 %v639_v26  ;;  %659 = vmatprep.subr.bf16.mxu0 %v778_v0  ;;  %v350_v26 = vld [vmem:[#allocation6 + $0x178] sm:$0xff] }
  0x4f   :  { %641 = vmatprep.subr.bf16.mxu1 %v778_v0  ;;  %v693_v27 = vpack.c.bf16 %v350_v26, %v349_v25 }
  0x51   :  { %661 = vmatpush3.bf16.msra.mxu0 %v660_v47 }
  0x52   :  { %643 = vmatpush3.bf16.msra.mxu1 %v642_v29  ;;  %662 = vmatprep.subr.bf16.mxu0 %v778_v0 }
  0x53   :  { %644 = vmatprep.subr.bf16.mxu1 %v778_v0 }
  0x55   :  { %664 = vmatpush3.bf16.msra.mxu0 %v663_v50 }
  0x56   :  { %646 = vmatpush3.bf16.msra.mxu1 %v645_v32  ;;  %665 = vmatprep.subr.bf16.mxu0 %v778_v0  ;;  %v444_v32 = vld [vmem:[%s900_s3 + $0x3] ss:$0 sm:$0xff] }
  0x57   :  { %671 = vmatprep.subr.bf16.mxu1 %v778_v0 }
  0x59   :  { %667 = vmatpush3.bf16.msra.mxu0 %v666_v53 }
  0x5a   :  { %668 = vmatprep.subr.bf16.mxu0 %v778_v0 }
  0x5d   :  { %670 = vmatpush3.bf16.msra.mxu0 %v669_v61 }
 0x113   :  { %v138_v55 = vpop.f32.mrb[0].mxu0 }
 0x114   :  { %v139_v56 = vadd.f32 %v437_v54, %v138_v55  ;;  %v511_v57 = vpop.f32.mrb[1].mxu0 }
 0x116   :  { %v142_v58 = vmax.f32 %v139_v56, 0.0 }
 0x118   :  { %545 = vmatmul.mubr.f32.vlgmr.msra.gmra.mrb[0].mxu1 %v142_v58 }
 0x119   :  { %614 = vmatprep.mubr.msk.f32.mxu1 %vm779_vm0, %v780_v1  ;;  %673 = vmatpush3.bf16.msra.mxu1 %v672_v3  ;;  %v341_v1 = vld [vmem:[#allocation6 + $0x130] sm:$0xff] }
 0x11a   :  { %674 = vmatprep.subr.bf16.mxu1 %v778_v0  ;;  %v681_v10 = vpack.c.bf16 %v342_v9, %v341_v1 }
 0x11d   :  { %676 = vmatpush3.bf16.msra.mxu1 %v675_v5 }
 0x11e   :  { %677 = vmatprep.subr.bf16.mxu1 %v778_v0 }
 0x121   :  { %679 = vmatpush3.bf16.msra.mxu1 %v678_v8 }
 0x122   :  { %680 = vmatprep.subr.bf16.mxu1 %v778_v0 }
 0x125   :  { %682 = vmatpush3.bf16.msra.mxu1 %v681_v10 }
 0x126   :  { %683 = vmatprep.subr.bf16.mxu1 %v778_v0 }
 0x129   :  { %685 = vmatpush3.bf16.msra.mxu1 %v684_v13 }
 0x12a   :  { %686 = vmatprep.subr.bf16.mxu1 %v778_v0 }
 0x12d   :  { %688 = vmatpush3.bf16.msra.mxu1 %v687_v16 }
 0x12e   :  { %689 = vmatprep.subr.bf16.mxu1 %v778_v0 }
 0x131   :  { %691 = vmatpush3.bf16.msra.mxu1 %v690_v19 }
 0x132   :  { %692 = vmatprep.subr.bf16.mxu1 %v778_v0 }
 0x135   :  { %694 = vmatpush3.bf16.msra.mxu1 %v693_v27 }
 0x1eb   :  { %v233_v21 = vpop.f32.mrb[0].mxu1 }
 0x1ec   :  { %v234_v22 = vadd.f32 %v440_v20, %v233_v21  ;;  %v546_v23 = vpop.f32.mrb[1].mxu1 }
 0x1ee   :  { %v237_v24 = vmax.f32 %v234_v22, 0.0 }
 0x1f0   :  { %580 = vmatmul.mubr.f32.vlgmr.msra.gmra.mrb[2].mxu0 %v237_v24 }
 0x2c3   :  { %v329_v29 = vpop.f32.mrb[2].mxu0 }
 0x2c4   :  { %v330_v30 = vadd.f32 %v442_v28, %v329_v29  ;;  %v581_v0 = vpop.f32.mrb[3].mxu0 }
 0x2c6   :  { %v333_v31 = vmax.f32 %v330_v30, 0.0 }
 0x2c8   :  { %615 = vmatmul.mubr.f32.vlgmr.msra.gmra.mrb[2].mxu1 %v333_v31 }
 0x39b   :  { %v425_v33 = vpop.f32.mrb[2].mxu1 }
 0x39c   :  { %v426_v34 = vadd.f32 %v444_v32, %v425_v33  ;;  %v616_v35 = vpop.f32.mrb[3].mxu1 }
 0x39e   :  { %430 = vst.msk [vmem:[%s901_s4] sm:$0xff] %vm429_vm2, %v426_v34 }
 0x39f   :  { %435 = vsyncpa [#allocation3], 1 }
 0x3a0   :  { %436 = vsyncpa [#allocation5], 1 }

</bundles_post_ra>
